<compile_context>
chip_gen: v6e
topology: v6e:2x2x1
jax: 0.10.0
libtpu: 0.0.40
codegen_flags: <defaults>
</compile_context>

<pallas_src>
import jax
import jax.numpy as jnp
from jax.experimental import pallas as pl
from jax.experimental.pallas import tpu as pltpu


def _round_up(x, m):
    return ((x + m - 1) // m) * m


def _block_diag(w, p):
    """p copies of w along the diagonal (built host-side; tiny)."""
    if p == 1:
        return w
    r, c = w.shape
    out = jnp.zeros((p * r, p * c), w.dtype)
    for i in range(p):
        out = out.at[i * r:(i + 1) * r, i * c:(i + 1) * c].set(w)
    return out


def _pe_kernel(x_ref, w1_ref, b1_ref, w2_ref, b2_ref, o_ref):
    # x_ref : (TR, P*D_in) tile of packed points
    # w1_ref: (P*D_in, P*E) block-diagonal W1 (resident across grid)
    # b1_ref: (1, P*E)      lane-tiled b1
    # w2_ref: (P*E, P*E)    block-diagonal W2
    # b2_ref: (1, P*E)      lane-tiled b2
    # o_ref : (TR, P*E)     tile of packed outputs
    x = x_ref[...].astype(jnp.float32)

    # Layer 1 on the MXU (block-diagonal W1 keeps the P packed points independent).
    h = jnp.dot(x, w1_ref[...].astype(jnp.float32),
                preferred_element_type=jnp.float32)
    h = jnp.maximum(h + b1_ref[...].astype(jnp.float32), 0.0)       # ReLU

    # Layer 2 on the MXU, f32 accumulation; cast only at the store.
    out = jnp.dot(h, w2_ref[...].astype(jnp.float32),
                  preferred_element_type=jnp.float32)
    out = out + b2_ref[...].astype(jnp.float32)
    o_ref[...] = out.astype(o_ref.dtype)


def learned_abs_pe_3d_v2(xyz, w1, b1, w2, b2, *, tile_rows=None, out_dtype=None,
                         vmem_limit_bytes=48 * 1024 * 1024):
    """xyz: (B, N, input_dim).  Weights stored transposed vs Conv1d kernels:
    w1: (input_dim, E), b1: (E,), w2: (E, E), b2: (E,).  Returns (B, N, E).

    `tile_rows` counts PACKED rows (each holds P = 128//E points when E
    divides 128, else 1 point).  `out_dtype=jnp.bfloat16` halves HBM writes."""
    B, N, D_in = xyz.shape
    E = w1.shape[1]
    M = B * N
    if out_dtype is None:
        out_dtype = xyz.dtype
    out_itemsize = jnp.dtype(out_dtype).itemsize

    # Lane packing factor: P points per row -> 128-lane-wide output rows.
    P = 128 // E if (E < 128 and 128 % E == 0) else 1

    # Pad point count to a multiple of P (padded rows are sliced off at the end).
    M_pad = _round_up(M, P)
    x_flat = xyz.reshape(M, D_in)
    if M_pad != M:
        x_flat = jnp.pad(x_flat, ((0, M_pad - M), (0, 0)))
    R = M_pad // P                               # packed rows
    x_packed = x_flat.reshape(R, P * D_in)       # free row-major view

    # Block-diagonal / lane-tiled weights (tiny; precompute once in production).
    w1_bd = _block_diag(w1, P)                   # (P*D_in, P*E)
    w2_bd = _block_diag(w2, P)                   # (P*E,   P*E)
    b1_rep = jnp.tile(b1.reshape(1, E), (1, P))  # (1, P*E)
    b2_rep = jnp.tile(b2.reshape(1, E), (1, P))  # (1, P*E)

    # Tile sizing from lane-PADDED VMEM bytes: double-buffered x/out blocks plus
    # f32 h / pre-cast-out intermediates.  ~28 MiB pipelined-buffer budget keeps
    # headroom inside v7x's 64 MiB physical VMEM (and v5e/v6e's 128 MiB).
    lane_x = _round_up(P * D_in, 128)
    lane_o = _round_up(P * E, 128)
    bytes_per_row = 2 * (lane_x * 4 + lane_o * out_itemsize) + 2 * lane_o * 4
    budget = 28 * 1024 * 1024
    if tile_rows is None:
        tile_rows = min(8192, max(8, (budget // bytes_per_row) // 8 * 8))
        # v7x has 2 TensorCores: give the "parallel" grid >= 2 steps when the
        # whole problem would otherwise fit in a single tile.
        if R > 1024 and pl.cdiv(R, tile_rows) < 2:
            tile_rows = _round_up(pl.cdiv(R, 2), 8)
    tile_rows = max(8, min(_round_up(int(tile_rows), 8), _round_up(R, 8)))
    grid_m = pl.cdiv(R, tile_rows)

    cost = pl.CostEstimate(
        flops=2 * R * (P * D_in) * (P * E) + 2 * R * (P * E) * (P * E),
        transcendentals=0,
        bytes_accessed=(M_pad * D_in * x_flat.dtype.itemsize
                        + M_pad * E * out_itemsize
                        + (w1_bd.size + w2_bd.size + b1_rep.size + b2_rep.size)
                        * w1_bd.dtype.itemsize),
    )

    out_packed = pl.pallas_call(
        _pe_kernel,
        out_shape=jax.ShapeDtypeStruct((R, P * E), out_dtype),
        grid_spec=pltpu.PrefetchScalarGridSpec(
            num_scalar_prefetch=0,
            grid=(grid_m,),
            in_specs=[
                pl.BlockSpec((tile_rows, P * D_in), lambda i: (i, 0)),  # packed pts
                pl.BlockSpec((P * D_in, P * E), lambda i: (0, 0)),       # W1 blk-diag
                pl.BlockSpec((1, P * E), lambda i: (0, 0)),              # b1 tiled
                pl.BlockSpec((P * E, P * E), lambda i: (0, 0)),          # W2 blk-diag
                pl.BlockSpec((1, P * E), lambda i: (0, 0)),              # b2 tiled
            ],
            out_specs=pl.BlockSpec((tile_rows, P * E), lambda i: (i, 0)),
        ),
        compiler_params=pltpu.CompilerParams(
            dimension_semantics=("parallel",),
            vmem_limit_bytes=vmem_limit_bytes,
        ),
        cost_estimate=cost,
    )(x_packed, w1_bd, b1_rep, w2_bd, b2_rep)

    out_flat = out_packed.reshape(M_pad, E)      # free row-major view
    if M_pad != M:
        out_flat = out_flat[:M]
    return out_flat.reshape(B, N, E)


def _reference(xyz, w1, b1, w2, b2):
    # Pure-JAX reference of the same math.
    h = jnp.maximum(jnp.einsum("bnd,de->bne", xyz, w1) + b1, 0.0)
    return jnp.einsum("bne,ef->bnf", h, w2) + b2


if __name__ == "__main__":
    input_dim = 3  # (x, y, z) coordinates
    key = jax.random.PRNGKey(0)
    k_x, k_w1, k_b1, k_w2, k_b2 = jax.random.split(key, 5)

    def make_params(E):
        w1 = 0.1 * jax.random.normal(k_w1, (input_dim, E), dtype=jnp.float32)
        b1 = 0.1 * jax.random.normal(k_b1, (E,), dtype=jnp.float32)
        w2 = 0.1 * jax.random.normal(k_w2, (E, E), dtype=jnp.float32)
        b2 = 0.1 * jax.random.normal(k_b2, (E,), dtype=jnp.float32)
        return w1, b1, w2, b2

    # 1) E=32 (lane-packed, P=4), even point count -> single full-lane tile.
    E = 32
    B, N = 2, 16
    w1, b1, w2, b2 = make_params(E)
    xyz = jax.random.normal(k_x, (B, N, input_dim), dtype=jnp.float32)
    out = jax.block_until_ready(learned_abs_pe_3d_v2(xyz, w1, b1, w2, b2))
    ref = _reference(xyz, w1, b1, w2, b2)
    assert out.shape == (B, N, E)
    assert jnp.allclose(out, ref, atol=1e-4, rtol=1e-4), "E=32 mismatch vs reference"

    # 2) E=32, ragged point count (M % P != 0) and ragged grid: M=42 -> pad to
    #    44, R=11 packed rows, tile_rows=8 -> 2 grid steps, masked last block.
    B2, N2 = 2, 21
    xyz2 = jax.random.normal(k_x, (B2, N2, input_dim), dtype=jnp.float32)
    out2 = jax.block_until_ready(
        learned_abs_pe_3d_v2(xyz2, w1, b1, w2, b2, tile_rows=8))
    ref2 = _reference(xyz2, w1, b1, w2, b2)
    assert out2.shape == (B2, N2, E)
    assert jnp.allclose(out2, ref2, atol=1e-4, rtol=1e-4), "ragged mismatch vs reference"

    # 3) E=48 (128 % E != 0 -> P=1 fallback; both layers still on the MXU).
    E3 = 48
    w1c, b1c, w2c, b2c = make_params(E3)
    out3 = jax.block_until_ready(learned_abs_pe_3d_v2(xyz, w1c, b1c, w2c, b2c))
    ref3 = _reference(xyz, w1c, b1c, w2c, b2c)
    assert out3.shape == (B, N, E3)
    assert jnp.allclose(out3, ref3, atol=1e-4, rtol=1e-4), "E=48 mismatch vs reference"

    print("KERNEL_OK")
</pallas_src>

<mosaic_0001>
module attributes {stable_mosaic.version = 11 : i64} {
  func.func @_pe_kernel(%arg0: i32, %arg1: memref<8x12xf32, #tpu.memory_space<vmem>>, %arg2: memref<12x128xf32, #tpu.memory_space<vmem>>, %arg3: memref<1x128xf32, #tpu.memory_space<vmem>>, %arg4: memref<128x128xf32, #tpu.memory_space<vmem>>, %arg5: memref<1x128xf32, #tpu.memory_space<vmem>>, %arg6: memref<8x128xf32, #tpu.memory_space<vmem>>) attributes {dimension_semantics = [#tpu.dimension_semantics<parallel>], iteration_bounds = array<i64: 1>, scalar_prefetch = 0 : i64, scratch_operands = 0 : i64, tpu.core_type = #tpu.core_type<tc>, window_params = [{transform_indices = @transform_0, window_bounds = array<i64: 8, 12>}, {pipeline_mode = #tpu.pipeline_mode<synchronous>, transform_indices = @transform_1, window_bounds = array<i64: 12, 128>}, {pipeline_mode = #tpu.pipeline_mode<synchronous>, transform_indices = @transform_2, window_bounds = array<i64: 1, 128>}, {pipeline_mode = #tpu.pipeline_mode<synchronous>, transform_indices = @transform_3, window_bounds = array<i64: 128, 128>}, {pipeline_mode = #tpu.pipeline_mode<synchronous>, transform_indices = @transform_4, window_bounds = array<i64: 1, 128>}, {transform_indices = @transform_5, window_bounds = array<i64: 8, 128>}]} {
    %c0 = arith.constant 0 : index
    %c0_0 = arith.constant 0 : index
    %0 = vector.load %arg1[%c0, %c0_0] : memref<8x12xf32, #tpu.memory_space<vmem>>, vector<8x12xf32>
    %c0_1 = arith.constant 0 : index
    %c0_2 = arith.constant 0 : index
    %1 = vector.load %arg2[%c0_1, %c0_2] : memref<12x128xf32, #tpu.memory_space<vmem>>, vector<12x128xf32>
    %cst = arith.constant dense<0.000000e+00> : vector<8x128xf32>
    %2 = tpu.matmul %0, %1, %cst {dimension_numbers = #tpu.dot_dimension_numbers<[1], [0], [0], [1], [0, 0, 1, 1], [], []>} : vector<8x12xf32>, vector<12x128xf32>, vector<8x128xf32> -> vector<8x128xf32>
    %c0_3 = arith.constant 0 : index
    %c0_4 = arith.constant 0 : index
    %3 = vector.load %arg3[%c0_3, %c0_4] : memref<1x128xf32, #tpu.memory_space<vmem>>, vector<1x128xf32>
    %4 = vector.broadcast %3 : vector<1x128xf32> to vector<8x128xf32>
    %5 = arith.addf %2, %4 : vector<8x128xf32>
    %cst_5 = arith.constant 0.000000e+00 : f32
    %6 = vector.broadcast %cst_5 : f32 to vector<8x128xf32>
    %7 = arith.maximumf %5, %6 : vector<8x128xf32>
    %c0_6 = arith.constant 0 : index
    %c0_7 = arith.constant 0 : index
    %8 = vector.load %arg4[%c0_6, %c0_7] : memref<128x128xf32, #tpu.memory_space<vmem>>, vector<128x128xf32>
    %cst_8 = arith.constant dense<0.000000e+00> : vector<8x128xf32>
    %9 = tpu.matmul %7, %8, %cst_8 {dimension_numbers = #tpu.dot_dimension_numbers<[1], [0], [0], [1], [0, 0, 1, 1], [], []>} : vector<8x128xf32>, vector<128x128xf32>, vector<8x128xf32> -> vector<8x128xf32>
    %c0_9 = arith.constant 0 : index
    %c0_10 = arith.constant 0 : index
    %10 = vector.load %arg5[%c0_9, %c0_10] : memref<1x128xf32, #tpu.memory_space<vmem>>, vector<1x128xf32>
    %11 = vector.broadcast %10 : vector<1x128xf32> to vector<8x128xf32>
    %12 = arith.addf %9, %11 : vector<8x128xf32>
    %c0_11 = arith.constant 0 : index
    %c0_12 = arith.constant 0 : index
    %13 = vector.load %arg6[%c0_11, %c0_12] : memref<8x128xf32, #tpu.memory_space<vmem>>, vector<8x128xf32>
    tpu.vector_store %arg6[%c0_11, %c0_12], %12 {strides = array<i32>} : memref<8x128xf32, #tpu.memory_space<vmem>>, vector<8x128xf32>,
    return
  }
  func.func @transform_0(%arg0: i32) -> (i32, i32) {
    %c0_i32 = arith.constant 0 : i32
    %c0_i32_0 = arith.constant 0 : i32
    return %arg0, %c0_i32 : i32, i32
  }
  func.func @transform_1(%arg0: i32) -> (i32, i32) {
    %c0_i32 = arith.constant 0 : i32
    %c0_i32_0 = arith.constant 0 : i32
    %c0_i32_1 = arith.constant 0 : i32
    return %c0_i32, %c0_i32_0 : i32, i32
  }
  func.func @transform_2(%arg0: i32) -> (i32, i32) {
    %c0_i32 = arith.constant 0 : i32
    %c0_i32_0 = arith.constant 0 : i32
    %c0_i32_1 = arith.constant 0 : i32
    return %c0_i32, %c0_i32_0 : i32, i32
  }
  func.func @transform_3(%arg0: i32) -> (i32, i32) {
    %c0_i32 = arith.constant 0 : i32
    %c0_i32_0 = arith.constant 0 : i32
    %c0_i32_1 = arith.constant 0 : i32
    return %c0_i32, %c0_i32_0 : i32, i32
  }
  func.func @transform_4(%arg0: i32) -> (i32, i32) {
    %c0_i32 = arith.constant 0 : i32
    %c0_i32_0 = arith.constant 0 : i32
    %c0_i32_1 = arith.constant 0 : i32
    return %c0_i32, %c0_i32_0 : i32, i32
  }
  func.func @transform_5(%arg0: i32) -> (i32, i32) {
    %c0_i32 = arith.constant 0 : i32
    %c0_i32_0 = arith.constant 0 : i32
    return %arg0, %c0_i32 : i32, i32
  }
}

</mosaic_0001>

<bundles_post_ra>
// kernel: tpu_custom_call.1
= control target key start
LH: loop header
LB: loop body
LE: loop exit
PB: predicated region body
PF: predicated region fallthrough
CT: control target
= control target key end

     0   :  { %10 = vsyncpa [#allocation3], 0  ;;  %s475_s0 = inlined_call_operand.hbm [shape: f32[8,12], index: 0, kind: input, shape index: {}]   ;;  %s476_s1 = inlined_call_operand.hbm [shape: f32[12,128], index: 1, kind: input, shape index: {}]   ;;  %s477_s2 = inlined_call_operand.vmem [shape: f32[1,128], index: 2, kind: input, shape index: {}]   ;;  %s478_s3 = inlined_call_operand.hbm [shape: f32[128,128], index: 3, kind: input, shape index: {}]   ;;  %s479_s4 = inlined_call_operand.vmem [shape: f32[1,128], index: 4, kind: input, shape index: {}]   ;;  %s480_s5 = inlined_call_operand.hbm [shape: f32[8,128], index: 5, kind: output, shape index: {}]  }
   0x1   :  { %11 = vsyncpa [#allocation6], 0 }
   0x2   :  { %12 = vsyncpa [#allocation4], 0  ;;  %s419_s18 = smov [#allocation5]  }
   0x3   :  { %s28_s19 = sshll.u32 %s419_s18, 4  ;;  %s29_s19 = int_to_ptr.vmem [resolvable:$true] %s28_s19 }
   0x4   :  { %s341_s20 = scalar_lea.vmem %s29_s19, 256  ;;  %p346_p1 = scmp.lt.s32.totalorder %s29_s19, %s29_s19 }
   0x5   :  { %p342_p0 = scmp.ne.s32.totalorder %s29_s19, %s341_s20  ;;  %p347_p2 = scmp.lt.s32.totalorder %s341_s20, %s341_s20 }
   0x7   :  { %p348_p3 = por %p347_p2, %p346_p1 }
   0x9   :  { %p349_p4 = pnand %p348_p3, %p342_p0 }
   0xb   :  { %352 = shalt.err (!%p349_p4)
}
   0xc   :  { %s420_s21 = smov 128   ;;  %s421_s22 = smov 8  }
   0xd   :  { %34 = dma.hbm_to_vmem [thread:$0]  %s476_s1, 256, %s29_s19, [#allocation6], %s420_s21, %s420_s21, %s421_s22  }
   0xe   :  { %s422_s25 = smov [#allocation2]   ;;  %s423_s27 = smov [#allocation7]  }
   0xf   :  { %s19_s26 = sshll.u32 %s422_s25, 4  ;;  %s42_s28 = sshll.u32 %s423_s27, 4  ;;  %s20_s26 = int_to_ptr.vmem [resolvable:$true] %s19_s26  ;;  %s43_s28 = int_to_ptr.vmem [resolvable:$true] %s42_s28 }
  0x10   :  { %s361_s29 = scalar_lea.vmem %s20_s26, 128  ;;  %p366_p6 = scmp.lt.s32.totalorder %s20_s26, %s20_s26 }
  0x11   :  { %p362_p5 = scmp.ne.s32.totalorder %s20_s26, %s361_s29  ;;  %p367_p7 = scmp.lt.s32.totalorder %s361_s29, %s361_s29 }
  0x13   :  { %p368_p8 = por %p367_p7, %p366_p6 }
  0x15   :  { %p369_p9 = pnand %p368_p8, %p362_p5 }
  0x17   :  { %372 = shalt.err (!%p369_p9)
}
  0x18   :  { %22 = dma.hbm_to_vmem [thread:$0]  %s475_s0, 128, %s20_s26, [#allocation3]  }
  0x19   :  { %s381_s7 = scalar_lea.vmem %s43_s28, 2048  ;;  %p386_p11 = scmp.lt.s32.totalorder %s43_s28, %s43_s28 }
  0x1a   :  { %p382_p10 = scmp.ne.s32.totalorder %s43_s28, %s381_s7  ;;  %p387_p12 = scmp.lt.s32.totalorder %s381_s7, %s381_s7 }
  0x1c   :  { %p388_p13 = por %p387_p12, %p386_p11 }
  0x1e   :  { %p389_p0 = pnand %p388_p13, %p382_p10 }
  0x20   :  { %392 = shalt.err (!%p389_p0)
}
  0x21   :  { %48 = dma.hbm_to_vmem [thread:$0]  %s478_s3, 2048, %s43_s28, [#allocation6], %s420_s21, %s420_s21, %s421_s22  }
  0x22   :  { %413 = dma.done.wait [#allocation3], 128  }
  0x23   :  { %414 = vsyncadd [#allocation3], 4294967168 }
  0x24   :  { %415 = dma.done.wait [#allocation6], 2304  }
  0x25   :  { %416 = vsyncadd [#allocation6], 4294964992  ;;  %v424_v0 = vmov 0.0   ;;  %vm425_vm0 = vmmov 0   ;;  %vm74_vm1 = vcmask 1043456   ;;  %v61_v2 = vld [vmem:[#allocation5] sm:$0xff] }
  0x26   :  { %283 = vmatprep.subr.mxu0 %v424_v0  ;;  %287 = vmatprep.mubr.msk.f32.mxu0 %vm425_vm0, %v424_v0  ;;  %v62_v1 = vld [vmem:[#allocation5 + $0x8] sm:$0xf]  ;;  %v60_v3 = vld [vmem:[#allocation2] sm:$0xff]  ;;  %vm70_vm2 = vcmask 97280   ;;  %v163_v5 = vld [vmem:[#allocation7 + $0x70] sm:$0xff]  ;;  %s426_s11 = smov [#allocation8]  }
  0x27   :  { %290 = vmatprep.subr.mxu1 %v424_v0  ;;  %322 = vmatprep.mubr.msk.f32.mxu1 %vm425_vm0, %v424_v0  ;;  %v164_v4 = vld [vmem:[#allocation7 + $0x78] sm:$0xff]  ;;  %v162_v6 = vld [vmem:[#allocation7 + $0x68] sm:$0xff]  ;;  %v161_v7 = vld [vmem:[#allocation7 + $0x60] sm:$0xff]  ;;  %s249_s12 = sshll.u32 %s426_s11, 4  ;;  %s250_s12 = int_to_ptr.vmem [resolvable:$true] %s249_s12 }
  0x28   :  { %284 = vmatpush3.msk.msra.mxu0 %vm74_vm1, %v62_v1  ;;  %291 = vmatpush3.msra.mxu1 %v164_v4  ;;  %v160_v8 = vld [vmem:[#allocation7 + $0x58] sm:$0xff]  ;;  %v159_v9 = vld [vmem:[#allocation7 + $0x50] sm:$0xff]  ;;  %v158_v10 = vld [vmem:[#allocation7 + $0x48] sm:$0xff]  ;;  %s393_s13 = scalar_lea.vmem %s250_s12, 128  ;;  %p398_p2 = scmp.lt.s32.totalorder %s250_s12, %s250_s12 }
  0x29   :  { %285 = vmatprep.subr.mxu0 %v424_v0  ;;  %292 = vmatprep.subr.mxu1 %v424_v0  ;;  %v157_v11 = vld [vmem:[#allocation7 + $0x40] sm:$0xff]  ;;  %v156_v12 = vld [vmem:[#allocation7 + $0x38] sm:$0xff]  ;;  %v155_v13 = vld [vmem:[#allocation7 + $0x30] sm:$0xff]  ;;  %p394_p1 = scmp.ne.s32.totalorder %s250_s12, %s393_s13  ;;  %p399_p3 = scmp.lt.s32.totalorder %s393_s13, %s393_s13 }
  0x2a   :  { %286 = vmatpush3.msra.mxu0 %v61_v2  ;;  %293 = vmatpush3.msra.mxu1 %v163_v5  ;;  %v154_v14 = vld [vmem:[#allocation7 + $0x28] sm:$0xff]  ;;  %v153_v15 = vld [vmem:[#allocation7 + $0x20] sm:$0xff]  ;;  %v152_v16 = vld [vmem:[#allocation7 + $0x18] sm:$0xff] }
  0x2b   :  { %288 = vmatmul.mubr.msk.f32.vlgmr.msra.gmra.mxu0 %vm70_vm2, %v60_v3  ;;  %294 = vmatprep.subr.mxu1 %v424_v0  ;;  %v151_v17 = vld [vmem:[#allocation7 + $0x10] sm:$0xff]  ;;  %v150_v18 = vld [vmem:[#allocation7 + $0x8] sm:$0xff]  ;;  %v149_v19 = vld [vmem:[#allocation7] sm:$0xff]  ;;  %p400_p4 = por %p399_p3, %p398_p2 }
  0x2c   :  { %295 = vmatpush3.msra.mxu1 %v162_v6  ;;  %v259_v20 = vld [vmem:[%s477_s2] ss:$0 sm:$0xff] }
  0x2d   :  { %296 = vmatprep.subr.mxu1 %v424_v0  ;;  %v262_v25 = vld [vmem:[%s479_s4] ss:$0 sm:$0xff]  ;;  %p401_p5 = pnand %p400_p4, %p394_p1 }
  0x2e   :  { %297 = vmatpush3.msra.mxu1 %v161_v7 }
  0x2f   :  { %298 = vmatprep.subr.mxu1 %v424_v0 }
  0x30   :  { %299 = vmatpush3.msra.mxu1 %v160_v8 }
  0x31   :  { %300 = vmatprep.subr.mxu1 %v424_v0 }
  0x32   :  { %301 = vmatpush3.msra.mxu1 %v159_v9 }
  0x33   :  { %302 = vmatprep.subr.mxu1 %v424_v0 }
  0x34   :  { %303 = vmatpush3.msra.mxu1 %v158_v10 }
  0x35   :  { %304 = vmatprep.subr.mxu1 %v424_v0 }
  0x36   :  { %305 = vmatpush3.msra.mxu1 %v157_v11 }
  0x37   :  { %306 = vmatprep.subr.mxu1 %v424_v0 }
  0x38   :  { %307 = vmatpush3.msra.mxu1 %v156_v12 }
  0x39   :  { %308 = vmatprep.subr.mxu1 %v424_v0 }
  0x3a   :  { %309 = vmatpush3.msra.mxu1 %v155_v13 }
  0x3b   :  { %310 = vmatprep.subr.mxu1 %v424_v0 }
  0x3c   :  { %311 = vmatpush3.msra.mxu1 %v154_v14 }
  0x3d   :  { %312 = vmatprep.subr.mxu1 %v424_v0 }
  0x3e   :  { %313 = vmatpush3.msra.mxu1 %v153_v15 }
  0x3f   :  { %314 = vmatprep.subr.mxu1 %v424_v0 }
  0x40   :  { %315 = vmatpush3.msra.mxu1 %v152_v16 }
  0x41   :  { %316 = vmatprep.subr.mxu1 %v424_v0 }
  0x42   :  { %317 = vmatpush3.msra.mxu1 %v151_v17 }
  0x43   :  { %318 = vmatprep.subr.mxu1 %v424_v0 }
  0x44   :  { %319 = vmatpush3.msra.mxu1 %v150_v18 }
  0x45   :  { %320 = vmatprep.subr.mxu1 %v424_v0 }
  0x46   :  { %321 = vmatpush3.msra.mxu1 %v149_v19 }
  0xeb   :  { %v144_v21 = vpop.f32.mrf.mxu0 }
  0xec   :  { %v145_v22 = vadd.f32 %v259_v20, %v144_v21 }
  0xed   :  { %v289_v23 = vpop.f32.mrf.mxu0 }
  0xee   :  { %v148_v24 = vmax.f32 %v145_v22, 0.0 }
  0xf0   :  { %323 = vmatmul.mubr.f32.vlgmr.msra.gmra.mxu1 %v148_v24 }
 0x1b0   :  { %v238_v26 = vpop.f32.mrf.mxu1 }
 0x1b1   :  { %v239_v27 = vadd.f32 %v262_v25, %v238_v26 }
 0x1b2   :  { %v324_v28 = vpop.f32.mrf.mxu1 }
 0x1b3   :  { %242 = vst [vmem:[#allocation8] sm:$0xff] %v239_v27 }
 0x1b4   :  { %404 = shalt.err (!%p401_p5)
}
 0x1b5   :  { %252 = dma.vmem_to_hbm [thread:$0]  %s250_s12, 128, %s480_s5, [#allocation4]  }
 0x1b6   :  { %417 = dma.done.wait [#allocation4], 128  }
 0x1b7   :  { %418 = vsyncadd [#allocation4], 4294967168 }
 0x1b8   :  { %256 = vsyncpa [#allocation3], 1 }
 0x1b9   :  { %257 = vsyncpa [#allocation6], 1 }
 0x1ba   :  { %258 = vsyncpa [#allocation4], 1 }

</bundles_post_ra>
